<compile_context>
chip_gen: v5e
topology: v5e:2x2
jax: 0.10.0
libtpu: 0.0.40
codegen_flags: <defaults>
</compile_context>

<pallas_src>
import functools

import jax
import jax.numpy as jnp
from jax.experimental import pallas as pl
from jax.experimental.pallas import tpu as pltpu

_DEFAULT_BLOCK_BUDGET = 1 * 1024 * 1024   # bytes per output block (review: <= 2-4 MiB)
_VMEM_LIMIT_BYTES = 32 * 1024 * 1024      # safe scoped limit on v5e/v6e/v7x


def _coord3_kernel(tcol_ref, base_ref, tmask_ref, o_ref):
    """out = base + t * mask.

    tcol_ref  : VMEM f32[BT, 1]   per-(b,t) time value (lane-broadcast).
    base_ref  : VMEM f32[1, L]    flattened (h, w, c) pattern, t-channel = 0
                                  (sublane-broadcast over the BT rows).
    tmask_ref : VMEM f32[1, L]    1.0 on t-channel lanes, 0.0 elsewhere.
    o_ref     : VMEM f32[BT, L]   lane-dense output tile.
    """
    o_ref[...] = base_ref[...] + tcol_ref[...] * tmask_ref[...]


def _tfill_kernel(tcol_ref, o_ref):
    """t_coord_only fast path: broadcast each row's t value across the lanes."""
    o_ref[...] = jnp.broadcast_to(tcol_ref[...], o_ref.shape)


def _choose_lane_tile(BT, N, budget_bytes):
    """Lane tile: multiple of 128, <= budget, and <= ~N/2 so >=2 grid steps."""
    if N <= 128:
        return N                                   # single full-extent block
    budget_elems = max(128, budget_bytes // 4)
    per_row = max(128, (budget_elems // max(BT, 1)) // 128 * 128)
    half = (((N + 1) // 2) + 127) // 128 * 128     # guarantees >= 2 lane blocks
    return min(per_row, half)


@functools.partial(jax.jit, static_argnums=(1, 2, 3, 4, 5, 6, 7, 8))
def _coord_grid(tflat, B, T, H, W, c0, c1, t_only, block_budget):
    """tflat: f32[B*T] per-row time value.  Returns (B,T,H,W,3) or (B,T,H,W,1)."""
    BT = B * T
    tcol = tflat.reshape(BT, 1).astype(jnp.float32)

    if t_only:
        N = H * W
        lane_tile = _choose_lane_tile(BT, N, block_budget)
        out = pl.pallas_call(
            _tfill_kernel,
            out_shape=jax.ShapeDtypeStruct((BT, N), jnp.float32),
            grid=(pl.cdiv(N, lane_tile),),
            in_specs=[pl.BlockSpec((BT, 1), lambda l: (0, 0))],
            out_specs=pl.BlockSpec((BT, lane_tile), lambda l: (0, l)),
            compiler_params=pltpu.CompilerParams(
                dimension_semantics=("parallel",),
                vmem_limit_bytes=_VMEM_LIMIT_BYTES),
            cost_estimate=pl.CostEstimate(
                flops=0, transcendentals=0, bytes_accessed=(BT * N + BT) * 4),
        )(tcol)
        return out.reshape(B, T, H, W, 1)

    N = H * W * 3
    dc = c1 - c0
    # Exactly the reference op order: c0 + (c1-c0) * (0.5 + arange)/num.
    y = c0 + dc * ((0.5 + jnp.arange(H, dtype=jnp.float32)) / jnp.float32(H))
    x = c0 + dc * ((0.5 + jnp.arange(W, dtype=jnp.float32)) / jnp.float32(W))
    zeros_hw = jnp.zeros((H, W), jnp.float32)
    base = jnp.stack(
        [zeros_hw,                                      # t channel (filled in kernel)
         jnp.broadcast_to(y[:, None], (H, W)),          # y channel
         jnp.broadcast_to(x[None, :], (H, W))],         # x channel
        axis=-1).reshape(1, N)
    tmask = jnp.stack(
        [jnp.ones((H, W), jnp.float32), zeros_hw, zeros_hw],
        axis=-1).reshape(1, N)

    lane_tile = _choose_lane_tile(BT, N, block_budget)
    out = pl.pallas_call(
        _coord3_kernel,
        out_shape=jax.ShapeDtypeStruct((BT, N), jnp.float32),
        grid=(pl.cdiv(N, lane_tile),),
        in_specs=[pl.BlockSpec((BT, 1), lambda l: (0, 0)),
                  pl.BlockSpec((1, lane_tile), lambda l: (0, l)),
                  pl.BlockSpec((1, lane_tile), lambda l: (0, l))],
        out_specs=pl.BlockSpec((BT, lane_tile), lambda l: (0, l)),
        compiler_params=pltpu.CompilerParams(
            dimension_semantics=("parallel",),
            vmem_limit_bytes=_VMEM_LIMIT_BYTES),
        cost_estimate=pl.CostEstimate(
            flops=2 * BT * N, transcendentals=0,
            bytes_accessed=(BT * N + 2 * N + BT) * 4),
    )(tcol, base, tmask)
    # Free reshape: (B*T, H*W*3) row-major == (B, T, H, W, 3) row-major.
    return out.reshape(B, T, H, W, 3)


class CoordSampler3D:
    """JAX/Pallas port of models/generalizable_INR/modules/coord_sampler.CoordSampler3D."""

    def __init__(self, coord_range, t_coord_only=False):
        self.coord_range = coord_range
        self.t_coord_only = t_coord_only

    def __call__(self, batch_size, s_shape, t_ids, coord_range=None,
                 upsample_ratio=1.0, device=None):
        del device  # JAX manages placement
        coord_range = self.coord_range if coord_range is None else coord_range
        c0, c1 = float(coord_range[0]), float(coord_range[1])
        H = int(int(s_shape[0]) * upsample_ratio)
        W = int(int(s_shape[1]) * upsample_ratio)

        if isinstance(t_ids, (list, tuple)):
            # shape2coordinate: T axis enumerates the given time ids.
            tvals = jnp.asarray(t_ids, dtype=jnp.float32)                  # (T,)
            T = int(tvals.shape[0])
            tflat = jnp.broadcast_to(tvals[None, :], (batch_size, T)).reshape(-1)
        else:
            # batchshape2coordinate: T == 1, per-batch time value (1 * t_ids[b]).
            T = 1
            tflat = jnp.asarray(t_ids, dtype=jnp.float32).reshape(-1)      # (B,)

        return _coord_grid(tflat, batch_size, T, H, W, c0, c1,
                           self.t_coord_only, _DEFAULT_BLOCK_BUDGET)


def _ref_coords(batch_size, H, W, tmap, c0, c1):
    """Pure-JAX reference mirroring PyTorch meshgrid('ij') + stack semantics."""
    T = tmap.shape[1]
    y = c0 + (c1 - c0) * (0.5 + jnp.arange(H, dtype=jnp.float32)) / H
    x = c0 + (c1 - c0) * (0.5 + jnp.arange(W, dtype=jnp.float32)) / W
    tg = jnp.broadcast_to(tmap[:, :, None, None], (batch_size, T, H, W))
    yg = jnp.broadcast_to(y[None, None, :, None], (batch_size, T, H, W))
    xg = jnp.broadcast_to(x[None, None, None, :], (batch_size, T, H, W))
    return jnp.stack([tg, yg, xg], axis=-1)


if __name__ == "__main__":
    key = jax.random.PRNGKey(0)
    B = 2
    s_shape = (16, 16)
    sampler = CoordSampler3D(coord_range=(-1.0, 1.0))

    # Branch 1: t_ids is a list (shape2coordinate).
    t_list = [0.0, 0.25, 0.5]
    coords_list = jax.block_until_ready(sampler(B, s_shape, t_list))
    tmap_list = jnp.broadcast_to(
        jnp.asarray(t_list, jnp.float32)[None, :], (B, len(t_list)))
    ref_list = _ref_coords(B, 16, 16, tmap_list, -1.0, 1.0)
    assert coords_list.shape == (B, len(t_list), 16, 16, 3)
    assert coords_list.dtype == jnp.float32
    assert jnp.allclose(coords_list, ref_list, atol=1e-6)

    # Branch 2: t_ids is an array of shape (B,) (batchshape2coordinate).
    t_tensor = jax.random.uniform(key, (B,), dtype=jnp.float32)
    coords_b = jax.block_until_ready(sampler(B, s_shape, t_tensor))
    ref_b = _ref_coords(B, 16, 16, t_tensor.reshape(B, 1), -1.0, 1.0)
    assert coords_b.shape == (B, 1, 16, 16, 3)
    assert jnp.allclose(coords_b, ref_b, atol=1e-6)

    # t_coord_only fast path (writes only the t channel).
    sampler_t = CoordSampler3D(coord_range=(-1.0, 1.0), t_coord_only=True)
    coords_t = jax.block_until_ready(sampler_t(B, s_shape, t_list))
    assert coords_t.shape == (B, len(t_list), 16, 16, 1)
    assert jnp.allclose(coords_t, ref_list[..., :1], atol=1e-6)

    # Exercise the multi-block lane path with a non-128-multiple N and a tiny
    # block budget (forces lane_tile = 128 and a masked partial last block).
    H2, W2 = 24, 17          # N = 24*17*3 = 1224, not a multiple of 128
    tflat2 = jnp.broadcast_to(
        jnp.asarray(t_list, jnp.float32)[None, :], (B, len(t_list))).reshape(-1)
    coords_tiled = jax.block_until_ready(
        _coord_grid(tflat2, B, len(t_list), H2, W2, -1.0, 1.0, False, 4096))
    ref_tiled = _ref_coords(B, H2, W2, tmap_list, -1.0, 1.0)
    assert coords_tiled.shape == (B, len(t_list), H2, W2, 3)
    assert jnp.allclose(coords_tiled, ref_tiled, atol=1e-6)

    # upsample_ratio path.
    coords_up = jax.block_until_ready(
        sampler(B, (8, 8), t_list, upsample_ratio=2.0))
    assert coords_up.shape == (B, len(t_list), 16, 16, 3)
    assert jnp.allclose(coords_up, ref_list, atol=1e-6)

    print("KERNEL_OK")
</pallas_src>

<mosaic_0001>
module attributes {stable_mosaic.version = 11 : i64} {
  func.func @_coord3_kernel(%arg0: i32, %arg1: memref<6x1xf32, #tpu.memory_space<vmem>>, %arg2: memref<1x384xf32, #tpu.memory_space<vmem>>, %arg3: memref<1x384xf32, #tpu.memory_space<vmem>>, %arg4: memref<6x384xf32, #tpu.memory_space<vmem>>) attributes {dimension_semantics = [#tpu.dimension_semantics<parallel>], iteration_bounds = array<i64: 2>, scalar_prefetch = 0 : i64, scratch_operands = 0 : i64, tpu.core_type = #tpu.core_type<tc>, window_params = [{pipeline_mode = #tpu.pipeline_mode<synchronous>, transform_indices = @transform_0, window_bounds = array<i64: 6, 1>}, {transform_indices = @transform_1, window_bounds = array<i64: 1, 384>}, {transform_indices = @transform_2, window_bounds = array<i64: 1, 384>}, {transform_indices = @transform_3, window_bounds = array<i64: 6, 384>}]} {
    %c0 = arith.constant 0 : index
    %c0_0 = arith.constant 0 : index
    %0 = vector.load %arg2[%c0, %c0_0] : memref<1x384xf32, #tpu.memory_space<vmem>>, vector<1x384xf32>
    %c0_1 = arith.constant 0 : index
    %c0_2 = arith.constant 0 : index
    %1 = vector.load %arg1[%c0_1, %c0_2] : memref<6x1xf32, #tpu.memory_space<vmem>>, vector<6x1xf32>
    %c0_3 = arith.constant 0 : index
    %c0_4 = arith.constant 0 : index
    %2 = vector.load %arg3[%c0_3, %c0_4] : memref<1x384xf32, #tpu.memory_space<vmem>>, vector<1x384xf32>
    %3 = vector.broadcast %1 : vector<6x1xf32> to vector<6x384xf32>
    %4 = vector.broadcast %2 : vector<1x384xf32> to vector<6x384xf32>
    %5 = arith.mulf %3, %4 : vector<6x384xf32>
    %6 = vector.broadcast %0 : vector<1x384xf32> to vector<6x384xf32>
    %7 = arith.addf %6, %5 : vector<6x384xf32>
    %c0_5 = arith.constant 0 : index
    %c0_6 = arith.constant 0 : index
    %8 = vector.load %arg4[%c0_5, %c0_6] : memref<6x384xf32, #tpu.memory_space<vmem>>, vector<6x384xf32>
    tpu.vector_store %arg4[%c0_5, %c0_6], %7 {strides = array<i32>} : memref<6x384xf32, #tpu.memory_space<vmem>>, vector<6x384xf32>,
    return
  }
  func.func @transform_0(%arg0: i32) -> (i32, i32) {
    %c0_i32 = arith.constant 0 : i32
    %c0_i32_0 = arith.constant 0 : i32
    %c0_i32_1 = arith.constant 0 : i32
    return %c0_i32, %c0_i32_0 : i32, i32
  }
  func.func @transform_1(%arg0: i32) -> (i32, i32) {
    %c0_i32 = arith.constant 0 : i32
    %c0_i32_0 = arith.constant 0 : i32
    return %c0_i32, %arg0 : i32, i32
  }
  func.func @transform_2(%arg0: i32) -> (i32, i32) {
    %c0_i32 = arith.constant 0 : i32
    %c0_i32_0 = arith.constant 0 : i32
    return %c0_i32, %arg0 : i32, i32
  }
  func.func @transform_3(%arg0: i32) -> (i32, i32) {
    %c0_i32 = arith.constant 0 : i32
    %c0_i32_0 = arith.constant 0 : i32
    return %c0_i32, %arg0 : i32, i32
  }
}

</mosaic_0001>

<bundles_post_ra>
// kernel: _coord_grid.1
= control target key start
LH: loop header
LB: loop body
LE: loop exit
PB: predicated region body
PF: predicated region fallthrough
CT: control target
= control target key end

     0   :  { %s330_s12 = smov 0   ;;  %s353_s0 = inlined_call_operand.vmem [shape: f32[6,1], index: 0, kind: input, shape index: {}]   ;;  %s354_s1 = inlined_call_operand.vmem [shape: f32[1,768], index: 1, kind: input, shape index: {}]   ;;  %s355_s2 = inlined_call_operand.vmem [shape: f32[1,768], index: 2, kind: input, shape index: {}]   ;;  %s356_s3 = inlined_call_operand.vmem [shape: f32[6,768], index: 3, kind: output, shape index: {}]  }
   0x1 LB: > { %s283_s13 = sadd.s32 4294967295, %s307_s12   ;;  %p287_p0 = scmp.ge.s32.totalorder %s307_s12, 1  ;;  %s307_s12 = sphi %s330_s12, %s13_s12  }
   0x2   : > { %p147_p1 = scmp.lt.s32.totalorder %s307_s12, 3 }
   0x4   : > { %p148_p2 = pnand %p287_p0, %p147_p1 }
   0x5   : > { %s174_s16 = smul.u32 (!%p148_p2), 3, %s283_s13 }
   0x6   : > { %151 = sbr.rel (%p148_p2) target bundleno = 135 (0x87), region = 32 }
   0x7   : > { %p175_p3 = scmp.lt.s32.totalorder (!%p148_p2), %s174_s16, 5 }
   0xb   : > { %v191_v0 = vld [vmem:[%s353_s0] sm:$0x3f]  ;;  %v309_v1 = vmov 0   ;;  %s358_s16 = smov (!%p175_p3, %s174_s16), 5 }
   0xc   : > { %300 = vset.pattern.permute.xlu0 %v309_v1  ;;  %s182_s19 = scalar_lea.vmem %s355_s2, %s358_s16  ;;  %s177_s22 = scalar_lea.vmem %s354_s1, %s358_s16 }
   0xd   : > { %195 = vperm.xlu0 %300, %v191_v0   ;;  %v192_v2 = vld [vmem:[%s182_s19] sm:$0x7]  ;;  %s288_s23 = sshll.u32 %s358_s16, 3 }
   0xe   : > { %v190_v3 = vld [vmem:[%s177_s22] sm:$0x7]  ;;  %v199_v4 = vperm.slane %v192_v2, 0  ;;  %v200_v5 = vperm.slane %v192_v2, 1  ;;  %v201_v6 = vperm.slane %v192_v2, 2  ;;  %s188_s26 = scalar_lea.vmem %s356_s3, %s288_s23 }
   0xf   : > { %v209_v7 = vperm.slane %v190_v3, 0  ;;  %v210_v8 = vperm.slane %v190_v3, 1  ;;  %v211_v9 = vperm.slane %v190_v3, 2 }
  0x7f   : > { %v196_v10 = vpop.permute.xlu0 %195 }
  0x80   : > { %v205_v11 = vmul.f32 %v199_v4, %v196_v10  ;;  %v206_v12 = vmul.f32 %v200_v5, %v196_v10  ;;  %v207_v13 = vmul.f32 %v201_v6, %v196_v10 }
  0x82   : > { %v215_v14 = vadd.f32 %v209_v7, %v205_v11  ;;  %v216_v15 = vadd.f32 %v210_v8, %v206_v12  ;;  %v217_v16 = vadd.f32 %v211_v9, %v207_v13 }
  0x84   : > { %218 = vst [vmem:[%s188_s26] sm:$0x3f] %v215_v14 }
  0x85   : > { %219 = vst [vmem:[%s188_s26 + $0x8] sm:$0x3f] %v216_v15 }
  0x86   : > { %220 = vst [vmem:[%s188_s26 + $0x10] sm:$0x3f] %v217_v16 }
  0x87 PF: > { %s13_s12 = sadd.s32 1, %s307_s12  }
  0x88   : > { %p10_p4 = scmp.ge.s32.totalorder %s13_s12, 4  }
  0x8a   :  { %12 = sbr.rel (!%p10_p4) target bundleno = 1 (0x1), region = 65 }

</bundles_post_ra>
